<compile_context>
chip_gen: v7x
topology: tpu7x:2x2x1
jax: 0.10.0
libtpu: 0.0.40
codegen_flags: <defaults>
</compile_context>

<pallas_src>
import jax
import jax.numpy as jnp
from jax.experimental import pallas as pl
from jax.experimental.pallas import tpu as pltpu

_LANE = 128        # TPU lane width: hidden axis is padded to this
_TB_MAX = 1024     # max batch-tile rows (sweepable; VMEM has huge headroom)


def _round_up(n, m):
    return pl.cdiv(n, m) * m


def _policy_kernel(x_ref, w1_ref, b1_ref, w2_ref, b2_ref, w3_ref, b3_ref, o_ref):
    # One batch tile per grid step; weights/biases are full, resident blocks.
    cdt = w1_ref.dtype  # matmul compute dtype (bf16 on the MXU fast path)

    x = x_ref[...].astype(cdt)

    h1 = jnp.dot(x, w1_ref[...], preferred_element_type=jnp.float32) + b1_ref[...]
    h1 = jnp.maximum(h1, 0.0)

    h2 = jnp.dot(h1.astype(cdt), w2_ref[...],
                 preferred_element_type=jnp.float32) + b2_ref[...]
    h2 = jnp.maximum(h2, 0.0)

    # Third layer projects straight to the real out_dim (no lane padding of the
    # output): logits / softmax / store are all (TB, out_dim).
    logits = jnp.dot(h2.astype(cdt), w3_ref[...],
                     preferred_element_type=jnp.float32) + b3_ref[...]

    # Numerically-stable softmax over the real output features. Exact
    # reciprocal so rows sum to 1 within f32 rounding (probabilities feed
    # sampling / log-prob downstream in PPO).
    m = jnp.max(logits, axis=-1, keepdims=True)
    e = jnp.exp(logits - m)
    denom = jnp.sum(e, axis=-1, keepdims=True)
    o_ref[...] = (e * pl.reciprocal(denom)).astype(o_ref.dtype)


def policy_network_forward(x, params, *, matmul_dtype=jnp.bfloat16, tb_max=_TB_MAX):
    """x: [B, input_dim] float32; params: dict of w1,b1,w2,b2,w3,b3.

    Weights stored [in_features, out_features] (transposed vs nn.Linear),
    biases [1, out_features]. Returns softmax probabilities [B, output_dim].
    """
    w1, b1, w2, b2, w3, b3 = (params["w1"], params["b1"], params["w2"],
                              params["b2"], params["w3"], params["b3"])
    B, in_dim = x.shape
    hid = w1.shape[1]
    out_dim = w3.shape[1]

    hid_p = int(_round_up(hid, _LANE))
    f32 = jnp.float32

    # Lane-dense padding of the hidden axis only (zero weights/biases keep the
    # padded hidden activations exactly 0 after ReLU; zero w3 rows contribute
    # nothing to the logits). The output axis is NOT padded.
    w1p = jnp.zeros((in_dim, hid_p), f32).at[:, :hid].set(w1).astype(matmul_dtype)
    b1p = jnp.zeros((1, hid_p), f32).at[:, :hid].set(b1)
    w2p = jnp.zeros((hid_p, hid_p), f32).at[:hid, :hid].set(w2).astype(matmul_dtype)
    b2p = jnp.zeros((1, hid_p), f32).at[:, :hid].set(b2)
    w3p = jnp.zeros((hid_p, out_dim), f32).at[:hid, :].set(w3).astype(matmul_dtype)
    b3p = b3.astype(f32)

    # Batch tile selection:
    #  * B <= 8: a single full-array block (block == full dim satisfies the
    #    (8,128) rule even for tiny B).
    #  * otherwise: multiple of 8, capped at tb_max, and at most ~B/2 so the
    #    grid has >= 2 "parallel" steps for v7x's two TensorCores.
    if B <= 8:
        TB = int(B)
    else:
        TB = int(min(tb_max, _round_up(pl.cdiv(B, 2), 8)))
    grid = (int(pl.cdiv(B, TB)),)   # ragged last tile handled by Pallas
                                    # (OOB reads unspecified, OOB writes dropped)

    resident = lambda a: pl.BlockSpec(a.shape, lambda i: (0,) * a.ndim)

    out = pl.pallas_call(
        _policy_kernel,
        out_shape=jax.ShapeDtypeStruct((B, out_dim), jnp.float32),
        grid=grid,
        in_specs=[
            pl.BlockSpec((TB, in_dim), lambda i: (i, 0)),   # x: tiled over batch
            resident(w1p), resident(b1p),                   # weights/biases stay
            resident(w2p), resident(b2p),                   # resident in VMEM
            resident(w3p), resident(b3p),
        ],
        out_specs=pl.BlockSpec((TB, out_dim), lambda i: (i, 0)),
        compiler_params=pltpu.CompilerParams(
            dimension_semantics=("parallel",),              # megacore on v7x
            vmem_limit_bytes=32 << 20,
        ),
    )(x, w1p, b1p, w2p, b2p, w3p, b3p)

    return out


def init_params(key, input_dim, output_dim, hidden_dim=64):
    # Deterministic synthetic init (shapes mirror the nn.Linear layers).
    ks = jax.random.split(key, 6)
    scale = 0.1
    return {
        "w1": scale * jax.random.normal(ks[0], (input_dim, hidden_dim), jnp.float32),
        "b1": scale * jax.random.normal(ks[1], (1, hidden_dim), jnp.float32),
        "w2": scale * jax.random.normal(ks[2], (hidden_dim, hidden_dim), jnp.float32),
        "b2": scale * jax.random.normal(ks[3], (1, hidden_dim), jnp.float32),
        "w3": scale * jax.random.normal(ks[4], (hidden_dim, output_dim), jnp.float32),
        "b3": scale * jax.random.normal(ks[5], (1, output_dim), jnp.float32),
    }


if __name__ == "__main__":
    key = jax.random.PRNGKey(0)
    k_x, k_p, k_x2 = jax.random.split(key, 3)

    batch, input_dim, output_dim, hidden_dim = 2, 16, 8, 64
    params = init_params(k_p, input_dim, output_dim, hidden_dim)

    # pure-JAX reference (f32 end to end)
    def ref(x, p):
        h1 = jax.nn.relu(x @ p["w1"] + p["b1"])
        h2 = jax.nn.relu(h1 @ p["w2"] + p["b2"])
        return jax.nn.softmax(h2 @ p["w3"] + p["b3"], axis=1)

    # --- small batch: single full-array block, grid of 1 -------------------
    x = jax.random.normal(k_x, (batch, input_dim), jnp.float32)
    out = jax.block_until_ready(policy_network_forward(x, params))
    assert out.shape == (batch, output_dim)
    # bf16 matmul operands -> loosen tolerance vs f32 reference.
    assert jnp.allclose(out, ref(x, params), atol=2e-2), "mismatch vs JAX reference"
    # exact reciprocal -> rows sum to 1 within f32 rounding.
    assert jnp.allclose(jnp.sum(out, axis=1), 1.0, atol=1e-5)

    # --- larger batch: 2 grid steps (v7x megacore path) + ragged last tile --
    x2 = jax.random.normal(k_x2, (40, input_dim), jnp.float32)
    out2 = jax.block_until_ready(policy_network_forward(x2, params))
    assert out2.shape == (40, output_dim)
    assert jnp.allclose(out2, ref(x2, params), atol=2e-2), "mismatch vs JAX reference"
    assert jnp.allclose(jnp.sum(out2, axis=1), 1.0, atol=1e-5)

    print("KERNEL_OK")
</pallas_src>

<mosaic_0001>
module attributes {stable_mosaic.version = 11 : i64} {
  func.func @_policy_kernel(%arg0: i32, %arg1: memref<2x16xf32, #tpu.memory_space<vmem>>, %arg2: memref<16x128xbf16, #tpu.memory_space<vmem>>, %arg3: memref<1x128xf32, #tpu.memory_space<vmem>>, %arg4: memref<128x128xbf16, #tpu.memory_space<vmem>>, %arg5: memref<1x128xf32, #tpu.memory_space<vmem>>, %arg6: memref<128x8xbf16, #tpu.memory_space<vmem>>, %arg7: memref<1x8xf32, #tpu.memory_space<vmem>>, %arg8: memref<2x8xf32, #tpu.memory_space<vmem>>) attributes {dimension_semantics = [#tpu.dimension_semantics<parallel>], iteration_bounds = array<i64: 1>, scalar_prefetch = 0 : i64, scratch_operands = 0 : i64, tpu.core_type = #tpu.core_type<tc>, window_params = [{transform_indices = @transform_0, window_bounds = array<i64: 2, 16>}, {pipeline_mode = #tpu.pipeline_mode<synchronous>, transform_indices = @transform_1, window_bounds = array<i64: 16, 128>}, {pipeline_mode = #tpu.pipeline_mode<synchronous>, transform_indices = @transform_2, window_bounds = array<i64: 1, 128>}, {pipeline_mode = #tpu.pipeline_mode<synchronous>, transform_indices = @transform_3, window_bounds = array<i64: 128, 128>}, {pipeline_mode = #tpu.pipeline_mode<synchronous>, transform_indices = @transform_4, window_bounds = array<i64: 1, 128>}, {pipeline_mode = #tpu.pipeline_mode<synchronous>, transform_indices = @transform_5, window_bounds = array<i64: 128, 8>}, {pipeline_mode = #tpu.pipeline_mode<synchronous>, transform_indices = @transform_6, window_bounds = array<i64: 1, 8>}, {transform_indices = @transform_7, window_bounds = array<i64: 2, 8>}]} {
    %c0 = arith.constant 0 : index
    %c0_0 = arith.constant 0 : index
    %0 = vector.load %arg1[%c0, %c0_0] : memref<2x16xf32, #tpu.memory_space<vmem>>, vector<2x16xf32>
    %1 = arith.truncf %0 : vector<2x16xf32> to vector<2x16xbf16>
    %c0_1 = arith.constant 0 : index
    %c0_2 = arith.constant 0 : index
    %2 = vector.load %arg2[%c0_1, %c0_2] : memref<16x128xbf16, #tpu.memory_space<vmem>>, vector<16x128xbf16>
    %cst = arith.constant dense<0.000000e+00> : vector<2x128xf32>
    %3 = tpu.matmul %1, %2, %cst {dimension_numbers = #tpu.dot_dimension_numbers<[1], [0], [0], [1], [0, 0, 1, 1], [], []>} : vector<2x16xbf16>, vector<16x128xbf16>, vector<2x128xf32> -> vector<2x128xf32>
    %c0_3 = arith.constant 0 : index
    %c0_4 = arith.constant 0 : index
    %4 = vector.load %arg3[%c0_3, %c0_4] : memref<1x128xf32, #tpu.memory_space<vmem>>, vector<1x128xf32>
    %5 = vector.broadcast %4 : vector<1x128xf32> to vector<2x128xf32>
    %6 = arith.addf %3, %5 : vector<2x128xf32>
    %cst_5 = arith.constant 0.000000e+00 : f32
    %7 = vector.broadcast %cst_5 : f32 to vector<2x128xf32>
    %8 = arith.maximumf %6, %7 : vector<2x128xf32>
    %9 = arith.truncf %8 : vector<2x128xf32> to vector<2x128xbf16>
    %c0_6 = arith.constant 0 : index
    %c0_7 = arith.constant 0 : index
    %10 = vector.load %arg4[%c0_6, %c0_7] : memref<128x128xbf16, #tpu.memory_space<vmem>>, vector<128x128xbf16>
    %cst_8 = arith.constant dense<0.000000e+00> : vector<2x128xf32>
    %11 = tpu.matmul %9, %10, %cst_8 {dimension_numbers = #tpu.dot_dimension_numbers<[1], [0], [0], [1], [0, 0, 1, 1], [], []>} : vector<2x128xbf16>, vector<128x128xbf16>, vector<2x128xf32> -> vector<2x128xf32>
    %c0_9 = arith.constant 0 : index
    %c0_10 = arith.constant 0 : index
    %12 = vector.load %arg5[%c0_9, %c0_10] : memref<1x128xf32, #tpu.memory_space<vmem>>, vector<1x128xf32>
    %13 = vector.broadcast %12 : vector<1x128xf32> to vector<2x128xf32>
    %14 = arith.addf %11, %13 : vector<2x128xf32>
    %cst_11 = arith.constant 0.000000e+00 : f32
    %15 = vector.broadcast %cst_11 : f32 to vector<2x128xf32>
    %16 = arith.maximumf %14, %15 : vector<2x128xf32>
    %17 = arith.truncf %16 : vector<2x128xf32> to vector<2x128xbf16>
    %c0_12 = arith.constant 0 : index
    %c0_13 = arith.constant 0 : index
    %18 = vector.load %arg6[%c0_12, %c0_13] : memref<128x8xbf16, #tpu.memory_space<vmem>>, vector<128x8xbf16>
    %cst_14 = arith.constant dense<0.000000e+00> : vector<2x8xf32>
    %19 = tpu.matmul %17, %18, %cst_14 {dimension_numbers = #tpu.dot_dimension_numbers<[1], [0], [0], [1], [0, 0, 1, 1], [], []>} : vector<2x128xbf16>, vector<128x8xbf16>, vector<2x8xf32> -> vector<2x8xf32>
    %c0_15 = arith.constant 0 : index
    %c0_16 = arith.constant 0 : index
    %20 = vector.load %arg7[%c0_15, %c0_16] : memref<1x8xf32, #tpu.memory_space<vmem>>, vector<1x8xf32>
    %21 = vector.broadcast %20 : vector<1x8xf32> to vector<2x8xf32>
    %22 = arith.addf %19, %21 : vector<2x8xf32>
    %cst_17 = arith.constant dense<0xFF800000> : vector<2xf32>
    %23 = vector.multi_reduction <maximumf>, %22, %cst_17 [1] : vector<2x8xf32> to vector<2xf32>
    %24 = vector.shape_cast %23 : vector<2xf32> to vector<2x1xf32>
    %25 = vector.broadcast %24 : vector<2x1xf32> to vector<2x8xf32>
    %26 = arith.subf %22, %25 : vector<2x8xf32>
    %27 = math.exp %26 : vector<2x8xf32>
    %cst_18 = arith.constant dense<0.000000e+00> : vector<2xf32>
    %28 = vector.multi_reduction <add>, %27, %cst_18 [1] : vector<2x8xf32> to vector<2xf32>
    %29 = vector.shape_cast %28 : vector<2xf32> to vector<2x1xf32>
    %30 = tpu.reciprocal %29 : vector<2x1xf32> -> vector<2x1xf32>
    %31 = vector.broadcast %30 : vector<2x1xf32> to vector<2x8xf32>
    %32 = arith.mulf %27, %31 : vector<2x8xf32>
    %c0_19 = arith.constant 0 : index
    %c0_20 = arith.constant 0 : index
    %33 = vector.load %arg8[%c0_19, %c0_20] : memref<2x8xf32, #tpu.memory_space<vmem>>, vector<2x8xf32>
    tpu.vector_store %arg8[%c0_19, %c0_20], %32 {strides = array<i32>} : memref<2x8xf32, #tpu.memory_space<vmem>>, vector<2x8xf32>,
    return
  }
  func.func @transform_0(%arg0: i32) -> (i32, i32) {
    %c0_i32 = arith.constant 0 : i32
    %c0_i32_0 = arith.constant 0 : i32
    return %arg0, %c0_i32 : i32, i32
  }
  func.func @transform_1(%arg0: i32) -> (i32, i32) {
    %c0_i32 = arith.constant 0 : i32
    %c0_i32_0 = arith.constant 0 : i32
    %c0_i32_1 = arith.constant 0 : i32
    return %c0_i32, %c0_i32_0 : i32, i32
  }
  func.func @transform_2(%arg0: i32) -> (i32, i32) {
    %c0_i32 = arith.constant 0 : i32
    %c0_i32_0 = arith.constant 0 : i32
    %c0_i32_1 = arith.constant 0 : i32
    return %c0_i32, %c0_i32_0 : i32, i32
  }
  func.func @transform_3(%arg0: i32) -> (i32, i32) {
    %c0_i32 = arith.constant 0 : i32
    %c0_i32_0 = arith.constant 0 : i32
    %c0_i32_1 = arith.constant 0 : i32
    return %c0_i32, %c0_i32_0 : i32, i32
  }
  func.func @transform_4(%arg0: i32) -> (i32, i32) {
    %c0_i32 = arith.constant 0 : i32
    %c0_i32_0 = arith.constant 0 : i32
    %c0_i32_1 = arith.constant 0 : i32
    return %c0_i32, %c0_i32_0 : i32, i32
  }
  func.func @transform_5(%arg0: i32) -> (i32, i32) {
    %c0_i32 = arith.constant 0 : i32
    %c0_i32_0 = arith.constant 0 : i32
    %c0_i32_1 = arith.constant 0 : i32
    return %c0_i32, %c0_i32_0 : i32, i32
  }
  func.func @transform_6(%arg0: i32) -> (i32, i32) {
    %c0_i32 = arith.constant 0 : i32
    %c0_i32_0 = arith.constant 0 : i32
    %c0_i32_1 = arith.constant 0 : i32
    return %c0_i32, %c0_i32_0 : i32, i32
  }
  func.func @transform_7(%arg0: i32) -> (i32, i32) {
    %c0_i32 = arith.constant 0 : i32
    %c0_i32_0 = arith.constant 0 : i32
    return %arg0, %c0_i32 : i32, i32
  }
}

</mosaic_0001>

<bundles_post_ra>
// kernel: tpu_custom_call.1
= control target key start
LH: loop header
LB: loop body
LE: loop exit
PB: predicated region body
PF: predicated region fallthrough
CT: control target
= control target key end

     0   :  { %v477_v1 = vmov 0.0   ;;  %vm478_vm0 = vmmov 0   ;;  %vm45_vm1 = vcmask 130048   ;;  %s618_s0 = inlined_call_operand.vmem [shape: f32[2,16], index: 0, kind: input, shape index: {}]   ;;  %s619_s1 = inlined_call_operand.vmem [shape: bf16[16,128], index: 1, kind: input, shape index: {}]   ;;  %s620_s2 = inlined_call_operand.vmem [shape: f32[1,128], index: 2, kind: input, shape index: {}]   ;;  %s621_s3 = inlined_call_operand.vmem [shape: bf16[128,128], index: 3, kind: input, shape index: {}]   ;;  %s622_s4 = inlined_call_operand.vmem [shape: f32[1,128], index: 4, kind: input, shape index: {}]   ;;  %s623_s5 = inlined_call_operand.vmem [shape: bf16[128,8], index: 5, kind: input, shape index: {}]   ;;  %s624_s6 = inlined_call_operand.vmem [shape: f32[1,8], index: 6, kind: input, shape index: {}]   ;;  %s625_s7 = inlined_call_operand.hbm [shape: f32[2,8], index: 7, kind: output, shape index: {}]  }
   0x1   :  { %v432_v0 = vld [vmem:[%s619_s1] sm:$0xff]   ;;  %383 = vmatprep.subr.bf16.mxu0 %v477_v1  ;;  %389 = vmatprep.subr.bf16.mxu1 %v477_v1  ;;  %v434_v5 = vld [vmem:[%s621_s3 + $0x8] sm:$0xff]   ;;  %v435_v6 = vld [vmem:[%s621_s3 + $0x10] sm:$0xff]  }
   0x2   :  { %v28_v2 = vld [vmem:[%s618_s0] sm:$0x3]  ;;  %384 = vmatpush3.bf16.msra.mxu0 %v432_v0  ;;  %385 = vmatprep.mubr.msk.bf16.mxu0 %vm478_vm0, %v477_v1  ;;  %v436_v7 = vld [vmem:[%s621_s3 + $0x18] sm:$0xff]  }
   0x3   :  { %v29_v3 = vpack.c.bf16 %v28_v2, %v28_v2  ;;  %v433_v4 = vld [vmem:[%s621_s3] sm:$0xff]   ;;  %405 = vmatprep.mubr.msk.bf16.mxu1 %vm478_vm0, %v477_v1  ;;  %409 = vmatprep.subr.bf16.mxu0 %v477_v1 }
   0x4   :  { %390 = vmatpush3.bf16.msra.mxu1 %v433_v4 }
   0x5   :  { %386 = vmatmul.mubr.msk.bf16.vlgmr.msra.gmra.mrb[0].mxu0 %vm45_vm1, %v29_v3  ;;  %391 = vmatprep.subr.bf16.mxu1 %v477_v1 }
   0x6   :  { %425 = vmatprep.mubr.msk.bf16.mxu0 %vm478_vm0, %v477_v1 }
   0x8   :  { %392 = vmatpush3.bf16.msra.mxu1 %v434_v5 }
   0x9   :  { %393 = vmatprep.subr.bf16.mxu1 %v477_v1 }
   0xc   :  { %394 = vmatpush3.bf16.msra.mxu1 %v435_v6 }
   0xd   :  { %395 = vmatprep.subr.bf16.mxu1 %v477_v1 }
   0xe   :  { %12 = vsyncpa [#allocation3], 0  ;;  %v437_v8 = vld [vmem:[%s621_s3 + $0x20] sm:$0xff]   ;;  %v438_v9 = vld [vmem:[%s621_s3 + $0x28] sm:$0xff]   ;;  %vm315_vm2 = vcmask 58368  }
   0xf   :  { %v439_v10 = vld [vmem:[%s621_s3 + $0x30] sm:$0xff]   ;;  %v440_v11 = vld [vmem:[%s621_s3 + $0x38] sm:$0xff]   ;;  %v441_v12 = vld [vmem:[%s623_s5] sm:$0xff]  }
  0x10   :  { %396 = vmatpush3.bf16.msra.mxu1 %v436_v7  ;;  %410 = vmatpush3.bf16.msra.mxu0 %v441_v12  ;;  %v442_v13 = vld [vmem:[%s623_s5 + $0x8] sm:$0xff]   ;;  %v443_v14 = vld [vmem:[%s623_s5 + $0x10] sm:$0xff]   ;;  %v444_v15 = vld [vmem:[%s623_s5 + $0x18] sm:$0xff]  }
  0x11   :  { %397 = vmatprep.subr.bf16.mxu1 %v477_v1  ;;  %411 = vmatprep.subr.bf16.mxu0 %v477_v1  ;;  %v445_v16 = vld [vmem:[%s623_s5 + $0x20] sm:$0xff]   ;;  %v446_v17 = vld [vmem:[%s623_s5 + $0x28] sm:$0xff]   ;;  %v447_v26 = vld [vmem:[%s623_s5 + $0x30] sm:$0xff]  }
  0x12   :  { %v342_v18 = vld [vmem:[%s620_s2] ss:$0 sm:$0xff]  ;;  %v448_v27 = vld [vmem:[%s623_s5 + $0x38] sm:$0xff]  }
  0x13   :  { %v345_v28 = vld [vmem:[%s622_s4] ss:$0 sm:$0xff]  ;;  %s479_s4 = smov [#allocation2]  }
  0x14   :  { %398 = vmatpush3.bf16.msra.mxu1 %v437_v8  ;;  %412 = vmatpush3.bf16.msra.mxu0 %v442_v13  ;;  %v354_v36 = vld [vmem:[%s624_s6] ss:$0 sm:$0xff]  ;;  %s334_s5 = sshll.u32 %s479_s4, 4  ;;  %s335_s5 = int_to_ptr.vmem [resolvable:$true] %s334_s5 }
  0x15   :  { %399 = vmatprep.subr.bf16.mxu1 %v477_v1  ;;  %413 = vmatprep.subr.bf16.mxu0 %v477_v1  ;;  %s453_s6 = scalar_lea.vmem %s335_s5, 32  ;;  %p458_p1 = scmp.lt.s32.totalorder %s335_s5, %s335_s5 }
  0x16   :  { %p454_p0 = scmp.ne.s32.totalorder %s335_s5, %s453_s6  ;;  %p459_p2 = scmp.lt.s32.totalorder %s453_s6, %s453_s6 }
  0x18   :  { %400 = vmatpush3.bf16.msra.mxu1 %v438_v9  ;;  %414 = vmatpush3.bf16.msra.mxu0 %v443_v14  ;;  %p460_p3 = por %p459_p2, %p458_p1 }
  0x19   :  { %401 = vmatprep.subr.bf16.mxu1 %v477_v1  ;;  %415 = vmatprep.subr.bf16.mxu0 %v477_v1 }
  0x1a   :  { %p461_p4 = pnand %p460_p3, %p454_p0 }
  0x1c   :  { %402 = vmatpush3.bf16.msra.mxu1 %v439_v10  ;;  %416 = vmatpush3.bf16.msra.mxu0 %v444_v15 }
  0x1d   :  { %403 = vmatprep.subr.bf16.mxu1 %v477_v1  ;;  %417 = vmatprep.subr.bf16.mxu0 %v477_v1 }
  0x20   :  { %404 = vmatpush3.bf16.msra.mxu1 %v440_v11  ;;  %418 = vmatpush3.bf16.msra.mxu0 %v445_v16 }
  0x21   :  { %419 = vmatprep.subr.bf16.mxu0 %v477_v1 }
  0x24   :  { %420 = vmatpush3.bf16.msra.mxu0 %v446_v17 }
  0x25   :  { %421 = vmatprep.subr.bf16.mxu0 %v477_v1 }
  0x28   :  { %422 = vmatpush3.bf16.msra.mxu0 %v447_v26 }
  0x29   :  { %423 = vmatprep.subr.bf16.mxu0 %v477_v1 }
  0x2c   :  { %424 = vmatpush3.bf16.msra.mxu0 %v448_v27 }
  0xd8   :  { %v83_v19 = vpop.f32.mrb[0].mxu0 }
  0xd9   :  { %v84_v20 = vadd.f32 %v342_v18, %v83_v19  ;;  %v387_v21 = vpop.f32.mrb[1].mxu0 }
  0xda   :  { %v86_v22 = vpop.f32.mrb[2].mxu0 }
  0xdb   :  { %v89_v23 = vmax.f32 %v84_v20, 0.0  ;;  %v388_v24 = vpop.f32.mrb[3].mxu0 }
  0xdd   :  { %v90_v25 = vpack.c.bf16 %v89_v23, %v89_v23 }
  0xdf   :  { %406 = vmatmul.mubr.bf16.vlgmr.msra.gmra.mrb[0].mxu1 %v90_v25 }
 0x1b2   :  { %v196_v29 = vpop.f32.mrb[0].mxu1 }
 0x1b3   :  { %v197_v30 = vadd.f32 %v345_v28, %v196_v29  ;;  %v407_v31 = vpop.f32.mrb[1].mxu1 }
 0x1b4   :  { %v199_v32 = vpop.f32.mrb[2].mxu1 }
 0x1b5   :  { %v202_v33 = vmax.f32 %v197_v30, 0.0  ;;  %v408_v34 = vpop.f32.mrb[3].mxu1 }
 0x1b7   :  { %v203_v35 = vpack.c.bf16 %v202_v33, %v202_v33 }
 0x1b9   :  { %426 = vmatmul.mubr.bf16.vlgmr.msra.gmra.mrb[4].mxu0 %v203_v35 }
 0x28c   :  { %v309_v37 = vpop.f32.mrb[4].mxu0 }
 0x28d   :  { %v310_v38 = vadd.f32 %v354_v36, %v309_v37  ;;  %v427_v39 = vpop.f32.mrb[5].mxu0 }
 0x28e   :  { %v312_v40 = vpop.f32.mrb[6].mxu0 }
 0x28f   :  { %v428_v41 = vpop.f32.mrb[7].mxu0  ;;  %v316_v42 = vsel %vm315_vm2, %v310_v38, -inf }
 0x290   :  { %317 = vmax.xlane.f32.xlu0 %v316_v42 }
 0x31d   :  { %v318_v43 = vpop.xlane.xlu0 %317 }
 0x31e   :  { %v319_v44 = vsub.f32 %v310_v38, %v318_v43 }
 0x320   :  { %v320_v45 = vmul.f32 1.442695, %v319_v44 }
 0x322   :  { %449 = vpow2.f32 %v320_v45 }
 0x32c   :  { %v450_v46 = vpop.eup %449 }
 0x32d   :  { %v322_v47 = vsel %vm315_vm2, %v450_v46, 0.0 }
 0x32e   :  { %323 = vadd.xlane.f32.xlu0 %v322_v47 }
 0x3bb   :  { %v324_v48 = vpop.xlane.xlu0 %323 }
 0x3bc   :  { %451 = vrcp.f32 %v324_v48 }
 0x3c6   :  { %v452_v49 = vpop.eup %451 }
 0x3c7   :  { %v326_v50 = vmul.f32 %v452_v49, %v450_v46 }
 0x3c9   :  { %327 = vst.msk [vmem:[#allocation2] sm:$0x3] %vm315_vm2, %v326_v50 }
 0x3ca   :  { %464 = shalt.err (!%p461_p4)
}
 0x3cb   :  { %s465_s16 = scalar_lea.hbm %s625_s7, 32 }
 0x3cc   :  { %p466_p5 = scmp.ne.s32.totalorder %s625_s7, %s465_s16  ;;  %p469_p6 = scmp.lt.u32.totalorder %s465_s16, %s625_s7 }
 0x3ce   :  { %p471_p7 = pnand %p469_p6, %p466_p5 }
 0x3d0   :  { %474 = shalt.err (!%p471_p7)
}
 0x3d1   :  { %337 = dma.vmem_to_hbm [thread:$0]  %s335_s5, 32, %s625_s7, [#allocation3]  }
 0x3d2   :  { %475 = dma.done.wait [#allocation3], 32  }
 0x3d3   :  { %476 = vsyncadd [#allocation3], 4294967264 }
 0x3d4   :  { %341 = vsyncpa [#allocation3], 1 }

</bundles_post_ra>
